<compile_context>
chip_gen: v6e
topology: v6e:2x2x1
jax: 0.10.0
libtpu: 0.0.40
codegen_flags: <defaults>
</compile_context>

<pallas_src>
import jax
import jax.numpy as jnp
from jax.experimental import pallas as pl
from jax.experimental.pallas import tpu as pltpu


def _gate_fusion_kernel(x1_ref, x2_ref, w1_ref, w2_ref, b_ref, o_ref):
    # x refs: (1, C, S_tile); w refs: (C, C); b ref: (C, 1) f32; o ref: (1, C, S_tile)
    x1 = x1_ref[0]                                    # (C, S_tile), activation dtype
    x2 = x2_ref[0]
    mm_dt = w1_ref.dtype                              # matmul operand dtype (set by wrapper)
    pre = (
        jnp.dot(w1_ref[...], x1.astype(mm_dt), preferred_element_type=jnp.float32)
        + jnp.dot(w2_ref[...], x2.astype(mm_dt), preferred_element_type=jnp.float32)
        + b_ref[...]                                  # (C, 1) broadcast over lanes
    )
    # sigmoid = 1 / (1 + exp(-pre)): exp and approx reciprocal both use the EUP slot,
    # leaving VPU slots free for the blend.
    gate = pl.reciprocal(1.0 + jnp.exp(-pre), approx=True)
    gate = gate.astype(x1.dtype)                      # blend in activation dtype
    # gate*x1 + (1-gate)*x2  ==  x2 + gate*(x1 - x2)   (one fewer mul + sub per element)
    o_ref[0] = (x2 + gate * (x1 - x2)).astype(o_ref.dtype)


def _round_up(x, m):
    return -(-x // m) * m


def _pick_spatial_tile(S, C, itemsize, n_batch, *, vmem_budget_bytes=24 << 20,
                       max_block_bytes=4 << 20):
    """Largest spatial tile (multiple of 128, or the full dim) whose double-buffered
    working set -- (2 inputs + 1 output) x 2 buffers with the channel dim padded to the
    sublane multiple -- plus resident weight/bias tiles fits the scoped-VMEM budget."""
    sublane = max(8, 32 // itemsize)                  # 8 (f32), 16 (bf16), 32 (int8/fp8)
    c_pad = _round_up(C, sublane)
    lane_c = _round_up(C, 128)
    # Weights/bias are grid-invariant but counted double-buffered to stay conservative.
    w_bytes = 2 * (2 * c_pad * lane_c * itemsize) + 2 * _round_up(C, 8) * 128 * 4
    avail = max(6 * 128 * c_pad * itemsize, vmem_budget_bytes - w_bytes)
    per_lane_bytes = 6 * c_pad * itemsize             # (2 in + 1 out) x double buffer
    tile = min(max_block_bytes // max(1, c_pad * itemsize), avail // per_lane_bytes)
    tile = max(128, tile // 128 * 128)
    if S <= tile:
        tile = S                                      # block dim == full array dim: legal
        # v7x megacore: a single-step grid leaves one TensorCore idle -> split S in two.
        if n_batch == 1 and S >= 256:
            tile = _round_up(_round_up(S, 2) // 2, 128)
    return tile


def gate_fusion(x1, x2, w, b):
    """Fused GateFusion forward.

    x1, x2 : (N, C, H, W) activations
    w      : (C, 2C)  -- Conv2d weight[..., 0, 0] of the 1x1 conv over cat([x1, x2])
    b      : (C,)     -- conv bias
    """
    assert x1.shape == x2.shape and x1.ndim == 4
    N, C, H, W = x1.shape
    assert w.shape == (C, 2 * C) and b.shape == (C,)
    S = H * W

    x1_3 = x1.reshape(N, C, S)
    x2_3 = x2.reshape(N, C, S)

    act_dtype = x1.dtype
    # MXU f32 is a multi-pass bf16 emulation (3-6x cost).  For small C the matmul hides
    # behind HBM traffic; once C is large enough to go MXU-bound, use native bf16.
    mm_dtype = act_dtype
    if act_dtype == jnp.float32 and C >= 256:
        mm_dtype = jnp.bfloat16
    # Cast weights once in the wrapper so the MXU sees matched operand dtypes (avoids a
    # per-grid-step in-kernel weight cast for bf16 activations).
    w1 = w[:, :C].astype(mm_dtype)                    # applied to x1 channels
    w2 = w[:, C:].astype(mm_dtype)                    # applied to x2 channels
    b2 = b.reshape(C, 1).astype(jnp.float32)          # keep bias/accumulation in f32

    itemsize = jnp.dtype(act_dtype).itemsize
    tile_s = _pick_spatial_tile(S, C, itemsize, N)
    grid = (N, pl.cdiv(S, tile_s))

    # If an xprof trace on v7x shows exposed DMA at step boundaries, sweep
    # pipeline_mode=pl.Buffered(3) on the two x specs (re-check the VMEM budget first).
    x_spec = pl.BlockSpec((1, C, tile_s), lambda n, s: (n, 0, s))
    w_spec = pl.BlockSpec((C, C), lambda n, s: (0, 0))
    b_spec = pl.BlockSpec((C, 1), lambda n, s: (0, 0))

    cost = pl.CostEstimate(
        flops=4 * N * C * C * S + 3 * N * C * S,
        transcendentals=N * C * S,
        bytes_accessed=(3 * N * C * S * itemsize
                        + 2 * C * C * jnp.dtype(mm_dtype).itemsize
                        + C * 4),
    )

    out3 = pl.pallas_call(
        _gate_fusion_kernel,
        out_shape=jax.ShapeDtypeStruct((N, C, S), act_dtype),
        grid=grid,
        in_specs=[x_spec, x_spec, w_spec, w_spec, b_spec],
        out_specs=pl.BlockSpec((1, C, tile_s), lambda n, s: (n, 0, s)),
        compiler_params=pltpu.CompilerParams(
            dimension_semantics=("parallel", "parallel"),
            # Explicit scoped-VMEM limit: comfortably above the ~24 MiB working-set
            # budget used by _pick_spatial_tile and safely under v7x's 64 MiB physical
            # VMEM (v5e/v6e have 128 MiB physical).
            vmem_limit_bytes=30 << 20,
        ),
        cost_estimate=cost,
    )(x1_3, x2_3, w1, w2, b2)

    return out3.reshape(N, C, H, W)


if __name__ == "__main__":
    key = jax.random.PRNGKey(0)
    k1, k2, kw, kb = jax.random.split(key, 4)

    N, C, H, W = 2, 4, 16, 16
    x1 = jax.random.normal(k1, (N, C, H, W), dtype=jnp.float32)
    x2 = jax.random.normal(k2, (N, C, H, W), dtype=jnp.float32)
    w = jax.random.normal(kw, (C, 2 * C), dtype=jnp.float32) / jnp.sqrt(2.0 * C)
    b = jax.random.normal(kb, (C,), dtype=jnp.float32) * 0.1

    out = jax.block_until_ready(gate_fusion(x1, x2, w, b))

    # Plain-JAX reference (same math as the PyTorch module).
    combined = jnp.concatenate([x1, x2], axis=1)                     # (N, 2C, H, W)
    pre = jnp.einsum("oc,nchw->nohw", w, combined) + b.reshape(1, C, 1, 1)
    gate = jax.nn.sigmoid(pre)
    ref = gate * x1 + (1.0 - gate) * x2

    assert out.shape == ref.shape and out.dtype == x1.dtype
    # MXU f32 matmuls run reduced-precision passes and the sigmoid uses an approx EUP
    # reciprocal -> modest tolerance.
    assert jnp.allclose(out, ref, atol=1e-2, rtol=1e-2), "mismatch vs reference"

    print("KERNEL_OK")
</pallas_src>

<mosaic_0001>
module attributes {stable_mosaic.version = 11 : i64} {
  func.func @_gate_fusion_kernel(%arg0: i32, %arg1: i32, %arg2: memref<1x4x256xf32, #tpu.memory_space<vmem>>, %arg3: memref<1x4x256xf32, #tpu.memory_space<vmem>>, %arg4: memref<4x4xf32, #tpu.memory_space<vmem>>, %arg5: memref<4x4xf32, #tpu.memory_space<vmem>>, %arg6: memref<4x1xf32, #tpu.memory_space<vmem>>, %arg7: memref<1x4x256xf32, #tpu.memory_space<vmem>>) attributes {dimension_semantics = [#tpu.dimension_semantics<parallel>, #tpu.dimension_semantics<parallel>], iteration_bounds = array<i64: 2, 1>, scalar_prefetch = 0 : i64, scratch_operands = 0 : i64, tpu.core_type = #tpu.core_type<tc>, window_params = [{transform_indices = @transform_0, window_bounds = array<i64: 1, 4, 256>}, {transform_indices = @transform_1, window_bounds = array<i64: 1, 4, 256>}, {pipeline_mode = #tpu.pipeline_mode<synchronous>, transform_indices = @transform_2, window_bounds = array<i64: 4, 4>}, {pipeline_mode = #tpu.pipeline_mode<synchronous>, transform_indices = @transform_3, window_bounds = array<i64: 4, 4>}, {pipeline_mode = #tpu.pipeline_mode<synchronous>, transform_indices = @transform_4, window_bounds = array<i64: 4, 1>}, {transform_indices = @transform_5, window_bounds = array<i64: 1, 4, 256>}]} {
    %c0 = arith.constant 0 : index
    %c0_0 = arith.constant 0 : index
    %c0_1 = arith.constant 0 : index
    %0 = vector.load %arg2[%c0, %c0_0, %c0_1] : memref<1x4x256xf32, #tpu.memory_space<vmem>>, vector<1x4x256xf32>
    %1 = vector.shape_cast %0 : vector<1x4x256xf32> to vector<4x256xf32>
    %c0_2 = arith.constant 0 : index
    %c0_3 = arith.constant 0 : index
    %c0_4 = arith.constant 0 : index
    %2 = vector.load %arg3[%c0_2, %c0_3, %c0_4] : memref<1x4x256xf32, #tpu.memory_space<vmem>>, vector<1x4x256xf32>
    %3 = vector.shape_cast %2 : vector<1x4x256xf32> to vector<4x256xf32>
    %c0_5 = arith.constant 0 : index
    %c0_6 = arith.constant 0 : index
    %4 = vector.load %arg4[%c0_5, %c0_6] : memref<4x4xf32, #tpu.memory_space<vmem>>, vector<4x4xf32>
    %cst = arith.constant dense<0.000000e+00> : vector<4x256xf32>
    %5 = tpu.matmul %4, %1, %cst {dimension_numbers = #tpu.dot_dimension_numbers<[1], [0], [0], [1], [0, 0, 1, 1], [], []>} : vector<4x4xf32>, vector<4x256xf32>, vector<4x256xf32> -> vector<4x256xf32>
    %c0_7 = arith.constant 0 : index
    %c0_8 = arith.constant 0 : index
    %6 = vector.load %arg5[%c0_7, %c0_8] : memref<4x4xf32, #tpu.memory_space<vmem>>, vector<4x4xf32>
    %cst_9 = arith.constant dense<0.000000e+00> : vector<4x256xf32>
    %7 = tpu.matmul %6, %3, %cst_9 {dimension_numbers = #tpu.dot_dimension_numbers<[1], [0], [0], [1], [0, 0, 1, 1], [], []>} : vector<4x4xf32>, vector<4x256xf32>, vector<4x256xf32> -> vector<4x256xf32>
    %8 = arith.addf %5, %7 : vector<4x256xf32>
    %c0_10 = arith.constant 0 : index
    %c0_11 = arith.constant 0 : index
    %9 = vector.load %arg6[%c0_10, %c0_11] : memref<4x1xf32, #tpu.memory_space<vmem>>, vector<4x1xf32>
    %10 = vector.broadcast %9 : vector<4x1xf32> to vector<4x256xf32>
    %11 = arith.addf %8, %10 : vector<4x256xf32>
    %cst_12 = arith.constant 0.000000e+00 : f32
    %12 = vector.broadcast %cst_12 : f32 to vector<4x256xf32>
    %13 = arith.subf %12, %11 : vector<4x256xf32>
    %14 = math.exp %13 : vector<4x256xf32>
    %cst_13 = arith.constant 1.000000e+00 : f32
    %15 = vector.broadcast %cst_13 : f32 to vector<4x256xf32>
    %16 = arith.addf %15, %14 : vector<4x256xf32>
    %17 = tpu.reciprocal %16 {approx = true} : vector<4x256xf32> -> vector<4x256xf32>
    %18 = arith.subf %1, %3 : vector<4x256xf32>
    %19 = arith.mulf %17, %18 : vector<4x256xf32>
    %20 = arith.addf %3, %19 : vector<4x256xf32>
    %c0_14 = arith.constant 0 : index
    %c0_15 = arith.constant 0 : index
    %c0_16 = arith.constant 0 : index
    %21 = vector.load %arg7[%c0_14, %c0_15, %c0_16] : memref<1x4x256xf32, #tpu.memory_space<vmem>>, vector<1x4x256xf32>
    %22 = vector.shape_cast %21 : vector<1x4x256xf32> to vector<4x256xf32>
    %23 = vector.shape_cast %20 : vector<4x256xf32> to vector<1x4x256xf32>
    tpu.vector_store %arg7[%c0_14, %c0_15, %c0_16], %23 {strides = array<i32>} : memref<1x4x256xf32, #tpu.memory_space<vmem>>, vector<1x4x256xf32>,
    return
  }
  func.func @transform_0(%arg0: i32, %arg1: i32) -> (i32, i32, i32) {
    %c0_i32 = arith.constant 0 : i32
    %c0_i32_0 = arith.constant 0 : i32
    return %arg0, %c0_i32, %arg1 : i32, i32, i32
  }
  func.func @transform_1(%arg0: i32, %arg1: i32) -> (i32, i32, i32) {
    %c0_i32 = arith.constant 0 : i32
    %c0_i32_0 = arith.constant 0 : i32
    return %arg0, %c0_i32, %arg1 : i32, i32, i32
  }
  func.func @transform_2(%arg0: i32, %arg1: i32) -> (i32, i32) {
    %c0_i32 = arith.constant 0 : i32
    %c0_i32_0 = arith.constant 0 : i32
    %c0_i32_1 = arith.constant 0 : i32
    return %c0_i32, %c0_i32_0 : i32, i32
  }
  func.func @transform_3(%arg0: i32, %arg1: i32) -> (i32, i32) {
    %c0_i32 = arith.constant 0 : i32
    %c0_i32_0 = arith.constant 0 : i32
    %c0_i32_1 = arith.constant 0 : i32
    return %c0_i32, %c0_i32_0 : i32, i32
  }
  func.func @transform_4(%arg0: i32, %arg1: i32) -> (i32, i32) {
    %c0_i32 = arith.constant 0 : i32
    %c0_i32_0 = arith.constant 0 : i32
    %c0_i32_1 = arith.constant 0 : i32
    return %c0_i32, %c0_i32_0 : i32, i32
  }
  func.func @transform_5(%arg0: i32, %arg1: i32) -> (i32, i32, i32) {
    %c0_i32 = arith.constant 0 : i32
    %c0_i32_0 = arith.constant 0 : i32
    return %arg0, %c0_i32, %arg1 : i32, i32, i32
  }
}

</mosaic_0001>

<bundles_post_ra>
// kernel: tpu_custom_call.1
= control target key start
LH: loop header
LB: loop body
LE: loop exit
PB: predicated region body
PF: predicated region fallthrough
CT: control target
= control target key end

     0   :  { %s1087_s0 = inlined_call_operand.hbm [shape: f32[2,4,256], index: 0, kind: input, shape index: {}]   ;;  %s1088_s1 = inlined_call_operand.hbm [shape: f32[2,4,256], index: 1, kind: input, shape index: {}]   ;;  %s1089_s2 = inlined_call_operand.vmem [shape: f32[4,4], index: 2, kind: input, shape index: {}]   ;;  %s1090_s3 = inlined_call_operand.vmem [shape: f32[4,4], index: 3, kind: input, shape index: {}]   ;;  %s1091_s4 = inlined_call_operand.vmem [shape: f32[4,1], index: 4, kind: input, shape index: {}]   ;;  %s1092_s5 = inlined_call_operand.hbm [shape: f32[2,4,256], index: 5, kind: output, shape index: {}]  }
   0x1   :  { %1093 = sst [smem:[#allocation11_spill]] %s1087_s0 }
   0x2   :  { %10 = vsyncpa [#allocation3], 0 }
   0x3   :  { %12 = vsyncpa [#allocation3 + $0x1], 0 }
   0x4   :  { %13 = vsyncpa [#allocation6], 0 }
   0x5   :  { %15 = vsyncpa [#allocation6 + $0x1], 0 }
   0x6   :  { %16 = vsyncpa [#allocation4], 0 }
   0x7   :  { %18 = vsyncpa [#allocation4 + $0x1], 0  ;;  %s912_s18 = smov 0   ;;  %s914_s19 = smov 0  }
   0x8   :  { %s916_s20 = smov 0   ;;  %s918_s21 = smov 0  }
   0x9   :  { %s920_s22 = smov 0   ;;  %s922_s23 = smov 0  }
   0xa LB: > { %s627_s24 = sadd.s32 4294967295, %s875_s23   ;;  %s628_s25 = sadd.s32 4294967294, %s875_s23   ;;  %s875_s23 = sphi %s922_s23, %s24_s23   ;;  %s871_s22 = sphi %s920_s22, %s1106_s22   ;;  %s867_s21 = sphi %s918_s21, %s1105_s21   ;;  %s863_s20 = sphi %s916_s20, %s1104_s20   ;;  %s859_s19 = sphi %s914_s19, %s1103_s19   ;;  %s855_s18 = sphi %s912_s18, %s1102_s18  }
   0xb   : > { %s36_s26 = sadd.s32 1, %s871_s22  ;;  %s45_s27 = sadd.s32 1, %s863_s20 }
   0xc   : > { %p38_p0 = scmp.ge.s32.totalorder %s36_s26, 2  ;;  %p52_p1 = scmp.ne.s32.totalorder %s863_s20, %s859_s19 }
   0xd   : > { %p53_p2 = scmp.eq.s32.totalorder %s875_s23, 0  ;;  %p58_p3 = scmp.ne.s32.totalorder %s859_s19, %s855_s18 }
   0xe   : > { %s1108_s26 = smov (%p38_p0, %s36_s26), 0  ;;  %p59_p5 = scmp.eq.s32.totalorder %s627_s24, 0 }
   0xf   : > { %p953_p4 = por %p53_p2, %p52_p1  ;;  %s40_s29 = ssub.s32 %s871_s22, %s1108_s26 }
  0x10   : > { %p175_p6 = scmp.eq.s32.totalorder %s627_s24, 1  ;;  %p43_p7 = scmp.eq.s32.totalorder %s40_s29, 0 }
  0x11   : > { %p959_p8 = por %p59_p5, %p58_p3  ;;  %p181_p10 = scmp.eq.s32.totalorder %s628_s25, 1 }
  0x12   : > { %p963_p9 = por %p175_p6, %p52_p1  ;;  %p672_p13 = scmp.lt.s32.totalorder %s875_s23, 2 }
  0x13   : > { %s968_s7 = scalar_select %p43_p7, %s863_s20, %s45_s27  }
  0x14   : > { %p970_p11 = por %p181_p10, %p58_p3  ;;  %s977_s9 = sand.u32 1, %s863_s20  }
  0x15   : > { %s631_s10 = sshll.u32 %s977_s9, 3  ;;  %s652_s11 = sshll.u32 %s871_s22, 7 }
  0x16   : > { %s1098_s0 = sld [smem:[#allocation11_spill]]  ;;  %s214_s15 = scalar_lea.vmem [#allocation2], %s631_s10 }
  0x17   : > { %s224_s16 = sshll.u32 %s214_s15, 4  ;;  %p986_p0 = pnand %p672_p13, %p953_p4  ;;  %s225_s16 = int_to_ptr.vmem [resolvable:$true] %s224_s16 }
  0x18   : > { %p637_p1 = scmp.ge.s32.totalorder %s875_s23, 1  ;;  %p250_p2 = scmp.lt.s32.totalorder %s875_s23, 3 }
  0x19   : > { %s211_s24 = scalar_lea.sflag [#allocation3], %s977_s9  ;;  %p737_p3 = pneg %p986_p0 }
  0x1a   : > { %s748_s25 = scalar_lea.vmem %s225_s16, 128  ;;  %s877_s27 = smov [#allocation2]  }
  0x1b   : > { %p749_p5 = scmp.ne.s32.totalorder %s225_s16, %s748_s25  ;;  %s753_s29 = sshll.u32 %s877_s27, 4  ;;  %s754_s29 = int_to_ptr.vmem [resolvable:$false] %s753_s29 }
  0x1c   : > { %s222_s14 = scalar_lea.hbm %s1098_s0, %s652_s11  ;;  %s755_s28 = scalar_lea.vmem %s754_s29, 256 }
  0x1d   : > { %p751_p6 = pnand %p749_p5, %p737_p3  ;;  %p756_p4 = scmp.lt.s32.totalorder %s225_s16, %s754_s29 }
  0x1e   : > { %p757_p10 = scmp.lt.s32.totalorder %s755_s28, %s748_s25 }
  0x1f   : > { %p752_p7 = pneg %p751_p6 }
  0x20   : > { %p758_p13 = por %p757_p10, %p756_p4 }
  0x22   : > { %p759_p12 = pnand %p758_p13, %p752_p7 }
  0x24   : > { %762 = shalt.err (!%p759_p12)
}
  0x25   : > { %664 = dma.hbm_to_vmem [thread:$0]  (!%p986_p0), %s222_s14, 128, %s225_s16, %s211_s24  }
  0x26   : > { %p1004_p5 = pnand %p637_p1, %p250_p2  ;;  %s243_s25 = scalar_lea.hbm %s1088_s1, %s652_s11 }
  0x27   : > { %s235_s27 = scalar_lea.vmem [#allocation5], %s631_s10  ;;  %s232_s28 = scalar_lea.sflag [#allocation6], %s977_s9 }
  0x28   : > { %s245_s29 = sshll.u32 %s235_s27, 4  ;;  %s878_s14 = smov [#allocation5]   ;;  %s246_s29 = int_to_ptr.vmem [resolvable:$true] %s245_s29 }
  0x29   : > { %s776_s0 = scalar_lea.vmem %s246_s29, 128  ;;  %s781_s16 = sshll.u32 %s878_s14, 4  ;;  %s782_s16 = int_to_ptr.vmem [resolvable:$false] %s781_s16 }
  0x2a   : > { %p777_p12 = scmp.ne.s32.totalorder %s246_s29, %s776_s0  ;;  %s783_s24 = scalar_lea.vmem %s782_s16, 256 }
  0x2b   : > { %p784_p1 = scmp.lt.s32.totalorder %s246_s29, %s782_s16  ;;  %p785_p2 = scmp.lt.s32.totalorder %s783_s24, %s776_s0 }
  0x2c   : > { %p779_p6 = pnand %p777_p12, %p737_p3 }
  0x2d   : > { %p786_p4 = por %p785_p2, %p784_p1 }
  0x2e   : > { %p780_p7 = pneg %p779_p6 }
  0x30   : > { %p787_p10 = pnand %p786_p4, %p780_p7 }
  0x32   : > { %790 = shalt.err (!%p787_p10)
}
  0x33   : > { %667 = dma.hbm_to_vmem [thread:$0]  (!%p986_p0), %s243_s25, 128, %s246_s29, %s232_s28  }
  0x34   : > { %254 = sbr.rel (%p1004_p5) target bundleno = 318 (0x13e), region = 40  ;;  %s1020_s9 = sand.u32 (!%p1004_p5), 1, %s859_s19  }
  0x35   : > { %s1023_s10 = sshll.u32 (!%p1004_p5), %s1020_s9, 3  ;;  %s257_s11 = scalar_lea.sflag (!%p1004_p5), [#allocation3], %s1020_s9 }
  0x36   : > { %s260_s0 = scalar_lea.vmem (!%p1004_p5), [#allocation2], %s1023_s10 }
  0x39   : > { %842 = dma.done.wait (%p959_p8), %s257_s11, 128  }
  0x3a   : > { %844 = vsyncadd (%p959_p8), %s257_s11, 4294967168  ;;  %s266_s17 = scalar_lea.sflag [#allocation6], %s1020_s9  ;;  %s269_s12 = scalar_lea.vmem [#allocation5], %s1023_s10 }
  0x3b   : > { %846 = dma.done.wait (%p959_p8), %s266_s17, 128  }
  0x3c   : > { %848 = vsyncadd (%p959_p8), %s266_s17, 4294967168  ;;  %v879_v0 = vmov 0.0   ;;  %v880_v1 = vmov 0   ;;  %v305_v2 = vld [vmem:[%s269_s12] sm:$0xff]  ;;  %vm314_vm0 = vcmask 1043456   ;;  %v304_v3 = vld [vmem:[%s260_s0] sm:$0xff] }
  0x3d   : > { %383 = vmatprep.mubr.f32.mxu0 %v879_v0  ;;  %463 = vmatprep.mubr.f32.mxu1 %v879_v0  ;;  %v309_v4 = vcombine.high %v305_v2, %v305_v2  ;;  %v391_v5 = vcombine.high %v304_v3, %v304_v3  ;;  %v470_v6 = vld [vmem:[%s1091_s4] sm:$0xf]  ;;  %vm310_vm1 = vcmask 31744   ;;  %v488_v26 = vsub.f32 %v304_v3, %v305_v2  ;;  %s654_s28 = sshll.u32 %s867_s21, 7  ;;  %s300_s14 = scalar_lea.vmem [#allocation7], %s1023_s10 }
  0x3e   : > { %724 = vset.pattern.permute.xlu0 %v880_v1  ;;  %v307_v7 = vld [vmem:[%s1090_s3] sm:$0xf]  ;;  %s517_s16 = sshll.u32 %s300_s14, 4  ;;  %s515_s0 = scalar_lea.hbm %s1092_s5, %s654_s28  ;;  %s518_s16 = int_to_ptr.vmem [resolvable:$true] %s517_s16 }
  0x3f   : > { %v306_v8 = vld [vmem:[%s1089_s2] sm:$0xf]  ;;  %473 = vperm.xlu0 %724, %v470_v6   ;;  %641 = vmatprep.subr.msk.mxu0 %vm314_vm0, %v309_v4  ;;  %v490_v27 = vcombine.high %v488_v26, %v488_v26  ;;  %s501_s17 = scalar_lea.sflag [#allocation4], %s1020_s9  ;;  %s791_s12 = scalar_lea.vmem %s518_s16, 128 }
  0x40   : > { %644 = vmatprep.subr.msk.mxu1 %vm314_vm0, %v391_v5  ;;  %642 = vmatpush1.msk.msra.mxu0 %vm314_vm0, %v305_v2  ;;  %p792_p8 = scmp.ne.s32.totalorder %s518_s16, %s791_s12  ;;  %s881_s13 = smov [#allocation7]  }
  0x41   : > { %645 = vmatpush1.msk.msra.mxu1 %vm314_vm0, %v304_v3  ;;  %643 = vmatmul.mubr.msk.f32.vlgmr.msra.gmra.mxu0 %vm310_vm1, %v307_v7  ;;  %s795_s15 = sshll.u32 %s881_s13, 4  ;;  %s796_s15 = int_to_ptr.vmem [resolvable:$false] %s795_s15 }
  0x42   : > { %646 = vmatmul.mubr.msk.f32.vlgmr.msra.gmra.mxu1 %vm310_vm1, %v306_v8  ;;  %p793_p0 = pnand %p792_p8, %p963_p9  ;;  %s797_s21 = scalar_lea.vmem %s796_s15, 256 }
  0x43   : > { %p798_p13 = scmp.lt.s32.totalorder %s518_s16, %s796_s15  ;;  %p799_p5 = scmp.lt.s32.totalorder %s797_s21, %s791_s12 }
  0x44   : > { %p794_p3 = pneg %p793_p0 }
  0x45   : > { %p800_p12 = por %p799_p5, %p798_p13 }
  0x47   : > { %p801_p6 = pnand %p800_p12, %p794_p3 }
  0xba   : > { %v474_v9 = vpop.permute.xlu0 %473 }
 0x101   : > { %v385_v10 = vpop.f32.mrf.mxu0 }
 0x102   : > { %v465_v11 = vpop.f32.mrf.mxu1 }
 0x103   : > { %v466_v12 = vadd.f32 %v465_v11, %v385_v10  ;;  %v387_v13 = vpop.f32.mrf.mxu0 }
 0x104   : > { %v467_v14 = vpop.f32.mrf.mxu1 }
 0x105   : > { %v476_v15 = vadd.f32 %v474_v9, %v466_v12  ;;  %v468_v16 = vadd.f32 %v467_v14, %v387_v13 }
 0x107   : > { %v478_v17 = vsub.f32 0.0, %v476_v15  ;;  %v477_v18 = vadd.f32 %v474_v9, %v468_v16 }
 0x109   : > { %v480_v19 = vmul.f32 1.442695, %v478_v17  ;;  %v479_v20 = vsub.f32 0.0, %v477_v18 }
 0x10b   : > { %727 = vpow2.f32 %v480_v19  ;;  %v482_v21 = vmul.f32 1.442695, %v479_v20 }
 0x10d   : > { %729 = vpow2.f32 %v482_v21 }
 0x118   : > { %v728_v22 = vpop.eup %727 }
 0x119   : > { %v484_v23 = vadd.f32 1.0, %v728_v22 }
 0x11a   : > { %v730_v24 = vpop.eup %729 }
 0x11b   : > { %731 = vrcp.f32 %v484_v23  ;;  %v485_v25 = vadd.f32 1.0, %v730_v24 }
 0x11d   : > { %733 = vrcp.f32 %v485_v25 }
 0x128   : > { %v732_v28 = vpop.eup %731 }
 0x129   : > { %v492_v30 = vmul.f32 %v732_v28, %v488_v26 }
 0x12a   : > { %v734_v29 = vpop.eup %733 }
 0x12b   : > { %v493_v31 = vmul.f32 %v734_v29, %v490_v27 }
 0x12d   : > { %v496_v32 = vcombine.low %v492_v30, %v493_v31 }
 0x12f   : > { %v498_v33 = vadd.f32 %v496_v32, %v305_v2 }
 0x131   : > { %499 = vst [vmem:[%s300_s14] sm:$0xff] %v498_v33 }
 0x132   : > { %804 = shalt.err (!%p801_p6)
}
 0x133   : > { %s805_s10 = scalar_lea.hbm %s515_s0, 128  ;;  %s809_s27 = scalar_lea.hbm %s1092_s5, 256 }
 0x134   : > { %p806_p7 = scmp.ne.s32.totalorder %s515_s0, %s805_s10  ;;  %p810_p4 = scmp.lt.s32.totalorder %s515_s0, %s1092_s5 }
 0x135   : > { %p811_p10 = scmp.lt.s32.totalorder %s809_s27, %s805_s10 }
 0x136   : > { %p807_p1 = pnand %p806_p7, %p963_p9 }
 0x137   : > { %p812_p8 = por %p811_p10, %p810_p4 }
 0x138   : > { %p808_p2 = pneg %p807_p1 }
 0x13a   : > { %p813_p0 = pnand %p812_p8, %p808_p2 }
 0x13c   : > { %816 = shalt.err (!%p813_p0)
}
 0x13d   : > { %659 = dma.vmem_to_hbm [thread:$0]  (%p963_p9), %s518_s16, 128, %s515_s0, %s501_s17  }
 0x13e PF: > { %s529_s28 = sand.u32 1, %s855_s18   ;;  %p1101_p3 = scmp.ge.s32.totalorder %s875_s23, 2 }
 0x13f   : > { %s530_s14 = scalar_lea.sflag [#allocation4], %s529_s28 }
 0x140   : > { %p669_p13 = pnand %p1101_p3, %p970_p11 }
 0x142   : > { %p670_p5 = pneg %p669_p13 }
 0x144   : > { %850 = dma.done.wait (%p670_p5), %s530_s14, 128  }
 0x145   : > { %852 = vsyncadd (%p670_p5), %s530_s14, 4294967168  ;;  %s24_s23 = sadd.s32 1, %s875_s23   ;;  %s1102_s18 = smov %s859_s19 }
 0x146   : > { %p21_p12 = scmp.ge.s32.totalorder %s24_s23, 4   ;;  %s1103_s19 = smov %s863_s20 }
 0x147   : > { %s1104_s20 = smov %s968_s7  ;;  %s1105_s21 = smov %s871_s22 }
 0x148   : > { %s1106_s22 = smov %s1108_s26  ;;  %23 = sbr.rel (!%p21_p12) target bundleno = 10 (0xa), region = 98 }
 0x14d   :  { %535 = vsyncpa [#allocation3], 1 }
 0x14e   :  { %537 = vsyncpa [#allocation3 + $0x1], 1 }
 0x14f   :  { %538 = vsyncpa [#allocation6], 1 }
 0x150   :  { %540 = vsyncpa [#allocation6 + $0x1], 1 }
 0x151   :  { %541 = vsyncpa [#allocation4], 1 }
 0x152   :  { %543 = vsyncpa [#allocation4 + $0x1], 1 }

</bundles_post_ra>
